<compile_context>
chip_gen: v7x
topology: tpu7x:2x2x1
jax: 0.10.0
libtpu: 0.0.40
codegen_flags: <defaults>
</compile_context>

<pallas_src>
import functools

import numpy as np
import jax
import jax.numpy as jnp
from jax.experimental import pallas as pl
from jax.experimental.pallas import tpu as pltpu


# ---------------------------------------------------------------------------
# Buffer setup — matches PyTorch __init__ exactly (plain JAX/NumPy glue).
# ---------------------------------------------------------------------------
def make_positional_encoding(embed_dim: int, max_len: int = 5000,
                             dtype=jnp.float32) -> jnp.ndarray:
    position = np.arange(0, max_len, dtype=np.float32)[:, None]          # (max_len, 1)
    div_term = np.exp(np.arange(0, embed_dim, 2, dtype=np.float32)
                      * -(np.log(10000.0) / embed_dim))                  # (ceil(E/2),)
    pe = np.zeros((max_len, embed_dim), dtype=np.float32)
    pe[:, 0::2] = np.sin(position * div_term)
    if embed_dim % 2 == 0:
        pe[:, 1::2] = np.cos(position * div_term)
    else:
        pe[:, 1::2] = np.cos(position * div_term[:-1])
    return jnp.asarray(pe, dtype=dtype)                                   # (max_len, E)


# ---------------------------------------------------------------------------
# Pallas kernel: y = dropout(x + pe)  (elementwise, memory-bound).
# ---------------------------------------------------------------------------
def _pe_add_dropout_kernel(seed_ref, x_ref, pe_ref, o_ref, *, p, apply_dropout):
    # x_ref: (1, TS, E) tile;  pe_ref: (TS, E) tile (shared across the batch axis).
    x = x_ref[...]
    y = x + pe_ref[...][None].astype(x.dtype)

    if apply_dropout and p > 0.0:
        if p >= 1.0:
            # torch.nn.Dropout(p=1.0) zeroes everything.
            y = jnp.zeros_like(y)
        else:
            shape = y.shape                                   # (1, TS, E)
            # Unique 32-bit counter per element across the whole grid.
            tile = (pl.program_id(0) * pl.num_programs(1)
                    + pl.program_id(1)).astype(jnp.uint32)
            seed = seed_ref[0].astype(jnp.uint32)
            rows = jax.lax.broadcasted_iota(jnp.uint32, shape, dimension=1)
            cols = jax.lax.broadcasted_iota(jnp.uint32, shape, dimension=2)
            ctr = rows * jnp.uint32(shape[2]) + cols
            ctr = ctr + tile * jnp.uint32(shape[1] * shape[2])
            # splitmix32-style mix, seed folded in (pure VPU integer ops).
            h = ctr + seed * jnp.uint32(0x9E3779B9)
            h = (h ^ (h >> 16)) * jnp.uint32(0x7FEB352D)
            h = (h ^ (h >> 15)) * jnp.uint32(0x846CA68B)
            h = h ^ (h >> 16)
            # Drop with probability ~p (off by at most 2^-32).
            threshold = jnp.uint32(min(int(round(p * (2 ** 32))), 2 ** 32 - 1))
            scale = jnp.asarray(1.0 / (1.0 - p), dtype=y.dtype)
            y = jnp.where(h >= threshold, y * scale, jnp.zeros_like(y))

    o_ref[...] = y.astype(o_ref.dtype)


def _choose_seq_tile(S: int, E: int, itemsize: int) -> int:
    """Largest seq-tile that is a multiple of the sublane count, <= 512 rows,
    and keeps ~6 double-buffered tiles inside a conservative 24 MiB VMEM
    budget (safe on v7x's smaller VMEM as well)."""
    sublane = max(8, 32 // itemsize)          # 8 for f32, 16 for bf16, 32 for int8
    budget_bytes = 24 * 1024 * 1024
    bufs = 6                                  # 2x input + 2x output + 2x pe
    rows_budget = max(sublane, budget_bytes // (bufs * E * itemsize))
    ts = min(S, 512, rows_budget)
    ts = max(sublane, (ts // sublane) * sublane)
    return ts


def positional_encoding_forward(x, pe, *, dropout_p=0.1, training=False, seed=0):
    """x: (B, S, E). pe: (max_len, E) full buffer. Returns (B, S, E)."""
    B, S, E = x.shape
    max_len = pe.shape[0]
    assert S <= max_len, "sequence longer than positional-encoding buffer"

    itemsize = jnp.dtype(x.dtype).itemsize
    ts = _choose_seq_tile(S, E, itemsize)
    num_s_tiles = pl.cdiv(S, ts)

    seed_arr = jnp.array([seed], dtype=jnp.int32)
    kernel = functools.partial(_pe_add_dropout_kernel,
                               p=float(dropout_p),
                               apply_dropout=bool(training))

    return pl.pallas_call(
        kernel,
        out_shape=jax.ShapeDtypeStruct((B, S, E), x.dtype),
        grid_spec=pltpu.PrefetchScalarGridSpec(
            num_scalar_prefetch=1,                            # seed -> SMEM
            grid=(num_s_tiles, B),                            # batch innermost
            in_specs=[
                pl.BlockSpec((1, ts, E), lambda s, b, seed: (b, s, 0)),   # x tile
                pl.BlockSpec((ts, E),    lambda s, b, seed: (s, 0)),      # pe tile
            ],
            out_specs=pl.BlockSpec((1, ts, E), lambda s, b, seed: (b, s, 0)),
        ),
        compiler_params=pltpu.CompilerParams(
            dimension_semantics=("parallel", "parallel")),
    )(seed_arr, x, pe)
    # TODO(synk): when E < 128, a lane-dense flattened layout (last dim a
    # multiple of 128) would avoid masked partial stores; kept the natural
    # (B, S, E) layout here since real transformer E >= 128 is already dense.


if __name__ == "__main__":
    B, S, E = 2, 8, 32
    MAX_LEN = 64
    P = 0.1

    key = jax.random.PRNGKey(0)
    x = jax.random.normal(key, (B, S, E), dtype=jnp.float32)
    pe = make_positional_encoding(E, max_len=MAX_LEN)

    # Eval-mode forward (dropout is identity) — deterministic, checkable.
    out_eval = positional_encoding_forward(x, pe, dropout_p=P, training=False)
    out_eval = jax.block_until_ready(out_eval)
    ref = np.asarray(x) + np.asarray(pe)[None, :S, :]
    np.testing.assert_allclose(np.asarray(out_eval), ref, rtol=1e-6, atol=1e-6)

    # Training-mode forward (stochastic inverted dropout, in-kernel hash PRNG).
    out_train = positional_encoding_forward(x, pe, dropout_p=P,
                                            training=True, seed=1234)
    out_train = jax.block_until_ready(out_train)
    assert out_train.shape == (B, S, E)

    # Every element must be either dropped (0) or ref scaled by 1/(1-p).
    out_t = np.asarray(out_train)
    scaled = ref / (1.0 - P)
    ok = (np.isclose(out_t, 0.0, atol=1e-6)
          | np.isclose(out_t, scaled, rtol=1e-5, atol=1e-5))
    assert ok.all(), "training output is neither 0 nor scaled(x+pe)"
    n_dropped = int(np.isclose(out_t, 0.0, atol=1e-6).sum())
    assert 0 < n_dropped < out_t.size, "dropout mask degenerate"

    print("KERNEL_OK")
</pallas_src>

<mosaic_0001>
module attributes {stable_mosaic.version = 11 : i64} {
  func.func @_pe_add_dropout_kernel(%arg0: i32, %arg1: i32, %arg2: memref<1xi32, #tpu.memory_space<smem>>, %arg3: memref<1x8x32xf32, #tpu.memory_space<vmem>>, %arg4: memref<8x32xf32, #tpu.memory_space<vmem>>, %arg5: memref<1x8x32xf32, #tpu.memory_space<vmem>>) attributes {dimension_semantics = [#tpu.dimension_semantics<parallel>, #tpu.dimension_semantics<parallel>], iteration_bounds = array<i64: 1, 2>, scalar_prefetch = 1 : i64, scratch_operands = 0 : i64, tpu.core_type = #tpu.core_type<tc>, window_params = [{transform_indices = @transform_0, window_bounds = array<i64: 1, 8, 32>}, {transform_indices = @transform_1, window_bounds = array<i64: 8, 32>}, {transform_indices = @transform_2, window_bounds = array<i64: 1, 8, 32>}]} {
    %c0 = arith.constant 0 : index
    %c0_0 = arith.constant 0 : index
    %c0_1 = arith.constant 0 : index
    %0 = vector.load %arg3[%c0, %c0_0, %c0_1] : memref<1x8x32xf32, #tpu.memory_space<vmem>>, vector<1x8x32xf32>
    %c0_2 = arith.constant 0 : index
    %c0_3 = arith.constant 0 : index
    %1 = vector.load %arg4[%c0_2, %c0_3] : memref<8x32xf32, #tpu.memory_space<vmem>>, vector<8x32xf32>
    %2 = vector.shape_cast %1 : vector<8x32xf32> to vector<1x8x32xf32>
    %3 = arith.addf %0, %2 : vector<1x8x32xf32>
    %c0_4 = arith.constant 0 : index
    %c0_5 = arith.constant 0 : index
    %c0_6 = arith.constant 0 : index
    %4 = vector.load %arg5[%c0_4, %c0_5, %c0_6] : memref<1x8x32xf32, #tpu.memory_space<vmem>>, vector<1x8x32xf32>
    tpu.vector_store %arg5[%c0_4, %c0_5, %c0_6], %3 {strides = array<i32>} : memref<1x8x32xf32, #tpu.memory_space<vmem>>, vector<1x8x32xf32>,
    return
  }
  func.func @transform_0(%arg0: i32, %arg1: i32, %arg2: memref<1xi32, #tpu.memory_space<smem>>) -> (i32, i32, i32) {
    %c0_i32 = arith.constant 0 : i32
    %c0_i32_0 = arith.constant 0 : i32
    return %arg1, %arg0, %c0_i32 : i32, i32, i32
  }
  func.func @transform_1(%arg0: i32, %arg1: i32, %arg2: memref<1xi32, #tpu.memory_space<smem>>) -> (i32, i32) {
    %c0_i32 = arith.constant 0 : i32
    %c0_i32_0 = arith.constant 0 : i32
    return %arg0, %c0_i32 : i32, i32
  }
  func.func @transform_2(%arg0: i32, %arg1: i32, %arg2: memref<1xi32, #tpu.memory_space<smem>>) -> (i32, i32, i32) {
    %c0_i32 = arith.constant 0 : i32
    %c0_i32_0 = arith.constant 0 : i32
    return %arg1, %arg0, %c0_i32 : i32, i32, i32
  }
}

</mosaic_0001>

<bundles_post_ra>
// kernel: tpu_custom_call.1
= control target key start
LH: loop header
LB: loop body
LE: loop exit
PB: predicated region body
PF: predicated region fallthrough
CT: control target
= control target key end

     0   :  { %9 = vsyncpa [#allocation5], 0  ;;  %s572_s0 = inlined_call_operand.<no memory space> [shape: s32[1], index: 0, kind: input, shape index: {}]   ;;  %s573_s1 = inlined_call_operand.vmem [shape: f32[2,8,32], index: 1, kind: input, shape index: {}]   ;;  %s574_s2 = inlined_call_operand.vmem [shape: f32[64,32], index: 2, kind: input, shape index: {}]   ;;  %s575_s3 = inlined_call_operand.hbm [shape: f32[2,8,32], index: 3, kind: output, shape index: {}]  }
   0x1   :  { %11 = vsyncpa [#allocation5 + $0x1], 0  ;;  %s457_s12 = smov 0   ;;  %s459_s13 = smov 0  }
   0x2   :  { %s461_s14 = smov 0   ;;  %s463_s15 = smov 0  }
   0x3   :  { %s465_s0 = smov 0   ;;  %s467_s16 = smov 0  }
   0x4 LB: > { %s289_s17 = sadd.s32 4294967295, %s434_s16   ;;  %s290_s18 = sadd.s32 4294967294, %s434_s16   ;;  %s434_s16 = sphi %s467_s16, %s17_s16   ;;  %s430_s0 = sphi %s465_s0, %s582_s0   ;;  %s426_s15 = sphi %s463_s15, %s581_s15   ;;  %s422_s14 = sphi %s461_s14, %s580_s14   ;;  %s418_s13 = sphi %s459_s13, %s579_s13   ;;  %s414_s12 = sphi %s457_s12, %s578_s12  }
   0x5   : > { %s26_s19 = sadd.s32 1, %s430_s0  ;;  %s92_s20 = sadd.s32 1, %s422_s14 }
   0x6   : > { %p27_p0 = scmp.ge.s32.totalorder %s26_s19, 2  ;;  %p102_p1 = scmp.ne.s32.totalorder %s422_s14, %s418_s13 }
   0x7   : > { %p103_p2 = scmp.eq.s32.totalorder %s289_s17, 1  ;;  %p108_p3 = scmp.ne.s32.totalorder %s418_s13, %s414_s12 }
   0x8   : > { %s584_s19 = smov (%p27_p0, %s26_s19), 0  ;;  %p109_p5 = scmp.eq.s32.totalorder %s290_s18, 1 }
   0x9   : > { %p497_p4 = por %p103_p2, %p102_p1  ;;  %s87_s22 = ssub.s32 %s430_s0, %s584_s19 }
   0xa   : > { %p294_p6 = scmp.ge.s32.totalorder %s434_s16, 1  ;;  %p90_p7 = scmp.eq.s32.totalorder %s87_s22, 0 }
   0xb   : > { %p504_p8 = por %p109_p5, %p108_p3  ;;  %p144_p9 = scmp.lt.s32.totalorder %s434_s16, 3 }
   0xc   : > { %s510_s24 = scalar_select %p90_p7, %s422_s14, %s92_s20  }
   0xd   : > { %p145_p10 = pnand %p294_p6, %p144_p9 }
   0xe   : > { %s169_s25 = sand.u32 (!%p145_p10), 1, %s418_s13   ;;  %p172_p11 = scmp.lt.s32.totalorder (!%p145_p10), %s426_s15, 1  ;;  %v184_v0 = vld [vmem:[%s574_s2] sm:$0xff] (!%p145_p10)  ;;  %vm186_vm0 = vcmask (!%p145_p10), 261120  }
   0xf   : > { %148 = sbr.rel (%p145_p10) target bundleno = 43 (0x2b), region = 28  ;;  %s295_s26 = sshll.u32 (!%p145_p10), %s169_s25, 3 }
  0x10   : > { %s298_s28 = sshll.u32 (!%p145_p10), %s426_s15, 7  ;;  %s171_s5 = scalar_lea.vmem (!%p145_p10), [#allocation4], %s295_s26 }
  0x11   : > { %s203_s6 = sshll.u32 (!%p145_p10), %s171_s5, 4  ;;  %s189_s17 = scalar_lea.sflag (!%p145_p10), [#allocation5], %s169_s25  ;;  %s522_s6 = int_to_ptr.vmem [resolvable:$true] %s203_s6 }
  0x12   : > { %s356_s18 = scalar_lea.vmem (!%p145_p10), %s522_s6, 128  ;;  %s436_s20 = smov (!%p145_p10), [#allocation4]  }
  0x13   : > { %p357_p12 = scmp.ne.s32.totalorder (!%p145_p10), %s522_s6, %s356_s18  ;;  %s360_s22 = sshll.u32 (!%p145_p10), %s436_s20, 4  ;;  %s361_s22 = int_to_ptr.vmem [resolvable:$false] %s360_s22 }
  0x14   : > { %s362_s26 = scalar_lea.vmem (!%p145_p10), %s361_s22, 256  ;;  %p363_p1 = scmp.lt.s32.totalorder (!%p145_p10), %s522_s6, %s361_s22 }
  0x15   : > { %p358_p13 = pnand (!%p145_p10), %p357_p12, %p497_p4  ;;  %p364_p2 = scmp.lt.s32.totalorder (!%p145_p10), %s362_s26, %s356_s18 }
  0x16   : > { %s173_s27 = scalar_select %p172_p11, %s426_s15, 1 }
  0x17   : > { %s527_s15 = scalar_lea.hbm %s575_s3, %s298_s28  ;;  %p359_p0 = pneg %p358_p13 }
  0x18   : > { %s296_s29 = sshll.u32 %s173_s27, 3  ;;  %p365_p3 = por %p364_p2, %p363_p1 }
  0x19   : > { %s178_s9 = scalar_lea.vmem %s573_s1, %s296_s29 }
  0x1a   : > { %v183_v1 = vld [vmem:[%s178_s9] sm:$0xff]  ;;  %p366_p5 = pnand %p365_p3, %p359_p0 }
  0x1b   : > { %v185_v2 = vadd.f32 %v184_v0, %v183_v1 }
  0x1d   : > { %187 = vst.msk [vmem:[%s171_s5] sm:$0xff] %vm186_vm0, %v185_v2 }
  0x1e   : > { %369 = shalt.err (!%p366_p5)
}
  0x1f   : > { %s370_s25 = scalar_lea.hbm %s527_s15, 128  ;;  %s374_s29 = scalar_lea.hbm %s575_s3, 256 }
  0x20   : > { %p371_p6 = scmp.ne.s32.totalorder %s527_s15, %s370_s25  ;;  %p375_p10 = scmp.lt.u32.totalorder %s527_s15, %s575_s3 }
  0x21   : > { %p376_p11 = scmp.lt.u32.totalorder %s374_s29, %s370_s25  ;;  %p378_p13 = scmp.lt.u32.totalorder %s370_s25, %s527_s15 }
  0x22   : > { %p372_p7 = pnand %p371_p6, %p497_p4 }
  0x23   : > { %p377_p12 = por %p376_p11, %p375_p10 }
  0x24   : > { %p373_p9 = pneg %p372_p7 }
  0x25   : > { %p379_p0 = por %p378_p13, %p377_p12 }
  0x27   : > { %p380_p1 = pnand %p379_p0, %p373_p9 }
  0x29   : > { %383 = shalt.err (!%p380_p1)
}
  0x2a   : > { %301 = dma.vmem_to_hbm [thread:$0]  (%p497_p4), %s522_s6, 128, %s527_s15, %s189_s17  }
  0x2b PF: > { %p307_p2 = scmp.ge.s32.totalorder %s434_s16, 2  ;;  %s215_s5 = sand.u32 1, %s414_s12  }
  0x2c   : > { %s216_s7 = scalar_lea.sflag [#allocation5], %s215_s5 }
  0x2d   : > { %p304_p3 = pnand %p307_p2, %p504_p8 }
  0x2f   : > { %409 = dma.done.wait (!%p304_p3), %s216_s7, 128  }
  0x30   : > { %411 = vsyncadd (!%p304_p3), %s216_s7, 4294967168  ;;  %s17_s16 = sadd.s32 1, %s434_s16   ;;  %s578_s12 = smov %s418_s13 }
  0x31   : > { %p14_p5 = scmp.ge.s32.totalorder %s17_s16, 4   ;;  %s579_s13 = smov %s422_s14 }
  0x32   : > { %s580_s14 = smov %s510_s24  ;;  %s581_s15 = smov %s430_s0 }
  0x33   : > { %s582_s0 = smov %s584_s19  ;;  %16 = sbr.rel (!%p14_p5) target bundleno = 4 (0x4), region = 66 }
  0x3a   :  { %221 = vsyncpa [#allocation5], 1 }
  0x3b   :  { %223 = vsyncpa [#allocation5 + $0x1], 1 }

</bundles_post_ra>
